<compile_context>
chip_gen: v7x
topology: tpu7x:2x2x1
jax: 0.10.0
libtpu: 0.0.40
codegen_flags: <defaults>
</compile_context>

<pallas_src>
import functools

import jax
import jax.numpy as jnp
from jax.experimental import pallas as pl
from jax.experimental.pallas import tpu as pltpu

_VMEM_LIMIT_BYTES = 48 * 1024 * 1024  # well under v7x's 64 MiB physical VMEM


def _round_up(v, m):
    return (v + m - 1) // m * m


# ----------------------------------------------------------------------------
# Fused Pallas kernel: all SAGE layers + head in one pallas_call
# ----------------------------------------------------------------------------
def _make_fused_kernel(tile_n, tile_k, n_pad):
    def kernel(a_ref, x_ref, wl_ref, wr_ref, b_ref, wh_ref, bh_ref,
               o_ref, acc_ref, hbuf_ref):
        # a_ref : (tile_n, tile_k) bf16   A_norm tile (streamed from HBM)
        # x_ref : (n_pad, c_pad)   bf16   input features, VMEM resident
        # wl_ref/wr_ref : (c_pad, c_pad) f32   current layer's weights
        # b_ref : (1, c_pad) f32           current layer's bias (lin_l only)
        # wh_ref: (1, c_pad) f32           head weight (row vector)
        # bh_ref: (1, 1) f32               head bias
        # o_ref : (tile_n, 128) f32        lane-dense output slab
        # acc_ref : (tile_n, c_pad) f32    aggregation accumulator
        # hbuf_ref: (2*n_pad, c_pad) bf16  ping-pong activation buffer
        l = pl.program_id(0)          # layer (phase)
        i = pl.program_id(1)          # node-row tile
        k = pl.program_id(2)          # neighbor tile (reduction)
        n_k = pl.num_programs(2)

        kk = pl.multiple_of(k * tile_k, tile_k)
        ii = pl.multiple_of(i * tile_n, tile_n)

        # Activation source: raw X for layer 0, otherwise the previous layer's
        # activations kept resident in the VMEM ping-pong buffer.
        prev_slot = (l + 1) % 2       # == (l - 1) % 2, in-bounds for l == 0
        is_first_layer = l == 0

        @pl.when(k == 0)
        def _init():
            acc_ref[...] = jnp.zeros_like(acc_ref)

        prev_off_k = pl.multiple_of(prev_slot * n_pad + kk, tile_k)
        src_blk = jnp.where(
            is_first_layer,
            x_ref[pl.ds(kk, tile_k), :],
            hbuf_ref[pl.ds(prev_off_k, tile_k), :],
        )
        # Mean aggregation: accumulate A[i, k] @ H_{l-1}[k] (bf16 MXU, f32 acc).
        acc_ref[...] += jnp.dot(a_ref[...], src_blk,
                                preferred_element_type=jnp.float32)

        @pl.when(k == n_k - 1)
        def _finalize():
            prev_off_i = pl.multiple_of(prev_slot * n_pad + ii, tile_n)
            root = jnp.where(
                is_first_layer,
                x_ref[pl.ds(ii, tile_n), :],
                hbuf_ref[pl.ds(prev_off_i, tile_n), :],
            ).astype(jnp.float32)

            h = (jnp.dot(acc_ref[...], wl_ref[...],
                         preferred_element_type=jnp.float32)
                 + jnp.dot(root, wr_ref[...],
                           preferred_element_type=jnp.float32)
                 + b_ref[...])
            h = jnp.maximum(h, 0.0)                      # ReLU

            # Stash this layer's activations in VMEM for the next layer
            # (harmless extra write on the last layer).
            cur_off_i = pl.multiple_of((l % 2) * n_pad + ii, tile_n)
            hbuf_ref[pl.ds(cur_off_i, tile_n), :] = h.astype(hbuf_ref.dtype)

            # Head: Linear(H, 1) + Sigmoid fused as a lane reduction. Written
            # every phase; the last (outermost) phase's write is final in HBM.
            z = jnp.sum(h * wh_ref[...], axis=-1, keepdims=True) + bh_ref[...]
            o_ref[...] = jnp.broadcast_to(jax.nn.sigmoid(z), o_ref.shape)

    return kernel


def _fused_forward(a_pad, x_pad, wl, wr, b, wh, bh, *, n_pad, tile, out_w):
    num_layers = wl.shape[0]
    c_pad = x_pad.shape[1]
    grid = (num_layers, n_pad // tile, n_pad // tile)
    kernel = _make_fused_kernel(tile, tile, n_pad)
    return pl.pallas_call(
        kernel,
        out_shape=jax.ShapeDtypeStruct((n_pad, out_w), jnp.float32),
        grid=grid,
        in_specs=[
            # A tiles: streamed + double-buffered by the BlockSpec pipeline.
            pl.BlockSpec((tile, tile), lambda l, i, k: (i, k)),
            # X: full-array, stays resident in VMEM (index never changes).
            pl.BlockSpec((n_pad, c_pad), lambda l, i, k: (0, 0)),
            # Stacked per-layer weights; the phase axis selects the layer.
            pl.BlockSpec((None, c_pad, c_pad), lambda l, i, k: (l, 0, 0)),
            pl.BlockSpec((None, c_pad, c_pad), lambda l, i, k: (l, 0, 0)),
            pl.BlockSpec((None, 1, c_pad), lambda l, i, k: (l, 0, 0)),
            # Head parameters.
            pl.BlockSpec((1, c_pad), lambda l, i, k: (0, 0)),
            pl.BlockSpec((1, 1), lambda l, i, k: (0, 0)),
        ],
        out_specs=pl.BlockSpec((tile, out_w), lambda l, i, k: (i, 0)),
        scratch_shapes=[
            pltpu.VMEM((tile, c_pad), jnp.float32),        # f32 aggregation acc
            pltpu.VMEM((2 * n_pad, c_pad), jnp.bfloat16),  # ping-pong activations
        ],
        compiler_params=pltpu.CompilerParams(
            dimension_semantics=("arbitrary", "arbitrary", "arbitrary"),
            vmem_limit_bytes=_VMEM_LIMIT_BYTES,
        ),
    )(a_pad, x_pad, wl, wr, b, wh, bh)


# ----------------------------------------------------------------------------
# Model wrapper (glue in plain JAX)
# ----------------------------------------------------------------------------
def build_norm_adj(edge_index, num_nodes):
    """Dense row-normalized incoming adjacency for mean aggregation.

    edge_index: (2, E) int32, row 0 = source j, row 1 = target i (PyG convention).
    """
    src, dst = edge_index[0], edge_index[1]
    a = jnp.zeros((num_nodes, num_nodes), jnp.float32).at[dst, src].add(1.0)
    deg = a.sum(axis=1, keepdims=True)
    return a / jnp.maximum(deg, 1.0)   # isolated nodes -> zero row (PyG mean aggr)


def init_params(key, in_channels, hidden_channels):
    """Deterministic parameter init matching the module's shapes."""
    params = {"layers": []}
    pre = in_channels
    for hc in hidden_channels:
        key, k1, k2, k3 = jax.random.split(key, 4)
        scale = 1.0 / jnp.sqrt(jnp.float32(pre))
        params["layers"].append(
            {
                "w_l": jax.random.uniform(k1, (pre, hc), jnp.float32, -scale, scale),
                "w_r": jax.random.uniform(k2, (pre, hc), jnp.float32, -scale, scale),
                "b": jax.random.uniform(k3, (1, hc), jnp.float32, -scale, scale),
            }
        )
        pre = hc
    key, k1, k2 = jax.random.split(key, 3)
    scale = 1.0 / jnp.sqrt(jnp.float32(pre))
    params["lin_w"] = jax.random.uniform(k1, (pre, 1), jnp.float32, -scale, scale)
    params["lin_b"] = jax.random.uniform(k2, (1, 1), jnp.float32, -scale, scale)
    return params


@functools.partial(jax.jit, static_argnames=("num_nodes",))
def my_graph_sage_forward(params, x, edge_index, num_nodes):
    n = num_nodes
    in_ch = x.shape[1]
    hidden = [lyr["w_l"].shape[1] for lyr in params["layers"]]
    num_layers = len(hidden)

    # Lane-dense padded channel width shared by all layers (zero padding keeps
    # the math exact for the real channels).
    c_pad = _round_up(max([in_ch] + hidden), 128)
    # 256-wide row tiles fill the v6e/v7x 256x256 MXU; 128 suffices for v5e
    # and for small graphs.
    tile = 256 if n >= 256 else 128
    n_pad = _round_up(n, tile)

    # Dense row-normalized adjacency in bf16 (A dominates HBM bytes); f32
    # accumulation happens inside the kernel.
    a = build_norm_adj(edge_index, n)
    a_pad = jnp.zeros((n_pad, n_pad), jnp.bfloat16).at[:n, :n].set(
        a.astype(jnp.bfloat16))
    x_pad = jnp.zeros((n_pad, c_pad), jnp.bfloat16).at[:n, :in_ch].set(
        x.astype(jnp.bfloat16))

    # Stack per-layer weights as (L, c_pad, c_pad) so the kernel's phase axis
    # selects them via BlockSpec.
    wl = jnp.zeros((num_layers, c_pad, c_pad), jnp.float32)
    wr = jnp.zeros((num_layers, c_pad, c_pad), jnp.float32)
    b = jnp.zeros((num_layers, 1, c_pad), jnp.float32)
    for li, lyr in enumerate(params["layers"]):
        ci, co = lyr["w_l"].shape
        wl = wl.at[li, :ci, :co].set(lyr["w_l"])
        wr = wr.at[li, :ci, :co].set(lyr["w_r"])
        b = b.at[li, :1, :co].set(lyr["b"])

    h_last = hidden[-1]
    wh = jnp.zeros((1, c_pad), jnp.float32).at[0, :h_last].set(params["lin_w"][:, 0])
    bh = params["lin_b"].astype(jnp.float32).reshape(1, 1)

    out_w = 128  # lane-dense output slab; column 0 carries the scalar result
    out = _fused_forward(a_pad, x_pad, wl, wr, b, wh, bh,
                         n_pad=n_pad, tile=tile, out_w=out_w)
    return out[:n, :1]


def reference_forward(params, x, edge_index, num_nodes):
    """Pure-JAX (f32, dense) reference for correctness checking."""
    a = build_norm_adj(edge_index, num_nodes)
    h = x
    for lyr in params["layers"]:
        agg = a @ h
        h = jnp.maximum(agg @ lyr["w_l"] + h @ lyr["w_r"] + lyr["b"], 0.0)
    return jax.nn.sigmoid(h @ params["lin_w"] + params["lin_b"])


# ----------------------------------------------------------------------------
if __name__ == "__main__":
    key = jax.random.PRNGKey(0)

    N = 16            # nodes
    E = 48            # edges
    IN_CHANNELS = 8
    HIDDEN_CHANNELS = [32, 32]   # num_layers = 2

    key, kx, ksrc, kdst, kp = jax.random.split(key, 5)
    x = jax.random.normal(kx, (N, IN_CHANNELS), jnp.float32)
    src = jax.random.randint(ksrc, (E,), 0, N, jnp.int32)
    dst = jax.random.randint(kdst, (E,), 0, N, jnp.int32)
    edge_index = jnp.stack([src, dst], axis=0)   # (2, E)

    params = init_params(kp, IN_CHANNELS, HIDDEN_CHANNELS)

    out = my_graph_sage_forward(params, x, edge_index, N)
    out = jax.block_until_ready(out)

    ref = reference_forward(params, x, edge_index, N)

    assert out.shape == (N, 1)
    assert bool(jnp.all((out >= 0.0) & (out <= 1.0)))
    max_err = float(jnp.max(jnp.abs(out - ref)))
    assert bool(jnp.allclose(out, ref, atol=3e-2, rtol=3e-2)), f"max abs err = {max_err}"
    print("KERNEL_OK")
</pallas_src>

<mosaic_0001>
module attributes {stable_mosaic.version = 11 : i64} {
  func.func private @main(%arg0: i32) attributes {dimension_semantics = [#tpu.dimension_semantics<core_parallel>], iteration_bounds = array<i64: 2>, tpu.core_type = #tpu.core_type<sc_scalar_subcore>, window_params = []} {
    return
  }
}

module attributes {stable_mosaic.version = 11 : i64} {
  func.func private @main(%arg0: i32) attributes {dimension_semantics = [#tpu.dimension_semantics<core_parallel>], iteration_bounds = array<i64: 2>, tpu.core_type = #tpu.core_type<sc_scalar_subcore>, window_params = []} {
    return
  }
}

module attributes {stable_mosaic.version = 11 : i64} {
  func.func @kernel(%arg0: i32, %arg1: i32, %arg2: i32, %arg3: memref<128x128xbf16, #tpu.memory_space<vmem>>, %arg4: memref<128x128xbf16, #tpu.memory_space<vmem>>, %arg5: memref<1x128x128xf32, #tpu.memory_space<vmem>>, %arg6: memref<1x128x128xf32, #tpu.memory_space<vmem>>, %arg7: memref<1x1x128xf32, #tpu.memory_space<vmem>>, %arg8: memref<1x128xf32, #tpu.memory_space<vmem>>, %arg9: memref<1x1xf32, #tpu.memory_space<vmem>>, %arg10: memref<128x128xf32, #tpu.memory_space<vmem>>, %arg11: memref<128x128xf32, #tpu.memory_space<vmem>>, %arg12: memref<256x128xbf16, #tpu.memory_space<vmem>>) attributes {dimension_semantics = [#tpu.dimension_semantics<arbitrary>, #tpu.dimension_semantics<arbitrary>, #tpu.dimension_semantics<arbitrary>], iteration_bounds = array<i64: 2, 1, 1>, scalar_prefetch = 0 : i64, scratch_operands = 2 : i64, tpu.core_type = #tpu.core_type<tc>, window_params = [{transform_indices = @transform_0, window_bounds = array<i64: 128, 128>}, {pipeline_mode = #tpu.pipeline_mode<synchronous>, transform_indices = @transform_1, window_bounds = array<i64: 128, 128>}, {transform_indices = @transform_2, window_bounds = array<i64: 1, 128, 128>}, {transform_indices = @transform_3, window_bounds = array<i64: 1, 128, 128>}, {transform_indices = @transform_4, window_bounds = array<i64: 1, 1, 128>}, {pipeline_mode = #tpu.pipeline_mode<synchronous>, transform_indices = @transform_5, window_bounds = array<i64: 1, 128>}, {pipeline_mode = #tpu.pipeline_mode<synchronous>, transform_indices = @transform_6, window_bounds = array<i64: 1, 1>}, {transform_indices = @transform_7, window_bounds = array<i64: 128, 128>}]} {
    %c128_i32 = arith.constant 128 : i32
    %0 = arith.muli %arg2, %c128_i32 : i32
    %1 = tpu.assume_multiple %0, 128 : i32
    %c128_i32_0 = arith.constant 128 : i32
    %2 = arith.muli %arg1, %c128_i32_0 : i32
    %3 = tpu.assume_multiple %2, 128 : i32
    %c1_i32 = arith.constant 1 : i32
    %4 = arith.addi %arg0, %c1_i32 : i32
    %c2_i32 = arith.constant 2 : i32
    %c0_i32 = arith.constant 0 : i32
    %5 = arith.cmpi eq, %c2_i32, %c0_i32 : i32
    %c1_i32_1 = arith.constant 1 : i32
    %6 = arith.select %5, %c1_i32_1, %c2_i32 : i32
    %7 = arith.remsi %4, %6 : i32
    %c0_i32_2 = arith.constant 0 : i32
    %8 = arith.cmpi ne, %7, %c0_i32_2 : i32
    %c0_i32_3 = arith.constant 0 : i32
    %9 = arith.cmpi slt, %7, %c0_i32_3 : i32
    %c0_i32_4 = arith.constant 0 : i32
    %10 = arith.cmpi slt, %6, %c0_i32_4 : i32
    %11 = arith.xori %9, %10 : i1
    %12 = arith.andi %11, %8 : i1
    %13 = arith.addi %7, %6 : i32
    %14 = arith.select %12, %13, %7 : i32
    %c0_i32_5 = arith.constant 0 : i32
    %15 = arith.cmpi eq, %arg0, %c0_i32_5 : i32
    %c0_i32_6 = arith.constant 0 : i32
    %16 = arith.cmpi eq, %arg2, %c0_i32_6 : i32
    %17 = arith.extui %16 : i1 to i32
    %c0_i32_7 = arith.constant 0 : i32
    %18 = arith.cmpi ne, %17, %c0_i32_7 : i32
    scf.if %18 {
      %cst_18 = arith.constant 0.000000e+00 : f32
      %35 = vector.broadcast %cst_18 : f32 to vector<128x128xf32>
      %c0_19 = arith.constant 0 : index
      %c0_20 = arith.constant 0 : index
      %36 = vector.load %arg11[%c0_19, %c0_20] : memref<128x128xf32, #tpu.memory_space<vmem>>, vector<128x128xf32>
      tpu.vector_store %arg11[%c0_19, %c0_20], %35 {strides = array<i32>} : memref<128x128xf32, #tpu.memory_space<vmem>>, vector<128x128xf32>,
    } else {
    }
    %c128_i32_8 = arith.constant 128 : i32
    %19 = arith.muli %14, %c128_i32_8 : i32
    %20 = arith.addi %19, %1 : i32
    %21 = tpu.assume_multiple %20, 128 : i32
    %22 = arith.index_cast %1 : i32 to index
    %c0 = arith.constant 0 : index
    %23 = vector.load %arg4[%22, %c0] : memref<128x128xbf16, #tpu.memory_space<vmem>>, vector<128x128xbf16>
    %24 = arith.index_cast %21 : i32 to index
    %c0_9 = arith.constant 0 : index
    %25 = vector.load %arg12[%24, %c0_9] : memref<256x128xbf16, #tpu.memory_space<vmem>>, vector<128x128xbf16>
    %26 = arith.select %15, %23, %25 : vector<128x128xbf16>
    %c0_10 = arith.constant 0 : index
    %c0_11 = arith.constant 0 : index
    %27 = vector.load %arg11[%c0_10, %c0_11] : memref<128x128xf32, #tpu.memory_space<vmem>>, vector<128x128xf32>
    %c0_12 = arith.constant 0 : index
    %c0_13 = arith.constant 0 : index
    %28 = vector.load %arg3[%c0_12, %c0_13] : memref<128x128xbf16, #tpu.memory_space<vmem>>, vector<128x128xbf16>
    %cst = arith.constant dense<0.000000e+00> : vector<128x128xf32>
    %29 = tpu.matmul %28, %26, %cst {dimension_numbers = #tpu.dot_dimension_numbers<[1], [0], [0], [1], [0, 0, 1, 1], [], []>} : vector<128x128xbf16>, vector<128x128xbf16>, vector<128x128xf32> -> vector<128x128xf32>
    %30 = arith.addf %27, %29 : vector<128x128xf32>
    %c0_14 = arith.constant 0 : index
    %c0_15 = arith.constant 0 : index
    %31 = vector.load %arg11[%c0_14, %c0_15] : memref<128x128xf32, #tpu.memory_space<vmem>>, vector<128x128xf32>
    tpu.vector_store %arg11[%c0_14, %c0_15], %30 {strides = array<i32>} : memref<128x128xf32, #tpu.memory_space<vmem>>, vector<128x128xf32>,
    %c0_i32_16 = arith.constant 0 : i32
    %32 = arith.cmpi eq, %arg2, %c0_i32_16 : i32
    %33 = arith.extui %32 : i1 to i32
    %c0_i32_17 = arith.constant 0 : i32
    %34 = arith.cmpi ne, %33, %c0_i32_17 : i32
    scf.if %34 {
      %c128_i32_18 = arith.constant 128 : i32
      %35 = arith.muli %14, %c128_i32_18 : i32
      %36 = arith.addi %35, %3 : i32
      %37 = tpu.assume_multiple %36, 128 : i32
      %38 = arith.index_cast %3 : i32 to index
      %c0_19 = arith.constant 0 : index
      %39 = vector.load %arg4[%38, %c0_19] : memref<128x128xbf16, #tpu.memory_space<vmem>>, vector<128x128xbf16>
      %40 = arith.index_cast %37 : i32 to index
      %c0_20 = arith.constant 0 : index
      %41 = vector.load %arg12[%40, %c0_20] : memref<256x128xbf16, #tpu.memory_space<vmem>>, vector<128x128xbf16>
      %42 = arith.select %15, %39, %41 : vector<128x128xbf16>
      %43 = arith.extf %42 : vector<128x128xbf16> to vector<128x128xf32>
      %c0_21 = arith.constant 0 : index
      %c0_22 = arith.constant 0 : index
      %44 = vector.load %arg11[%c0_21, %c0_22] : memref<128x128xf32, #tpu.memory_space<vmem>>, vector<128x128xf32>
      %c0_23 = arith.constant 0 : index
      %c0_24 = arith.constant 0 : index
      %c0_25 = arith.constant 0 : index
      %45 = vector.load %arg5[%c0_23, %c0_24, %c0_25] : memref<1x128x128xf32, #tpu.memory_space<vmem>>, vector<1x128x128xf32>
      %46 = vector.shape_cast %45 : vector<1x128x128xf32> to vector<128x128xf32>
      %cst_26 = arith.constant dense<0.000000e+00> : vector<128x128xf32>
      %47 = tpu.matmul %44, %46, %cst_26 {dimension_numbers = #tpu.dot_dimension_numbers<[1], [0], [0], [1], [0, 0, 1, 1], [], []>} : vector<128x128xf32>, vector<128x128xf32>, vector<128x128xf32> -> vector<128x128xf32>
      %c0_27 = arith.constant 0 : index
      %c0_28 = arith.constant 0 : index
      %c0_29 = arith.constant 0 : index
      %48 = vector.load %arg6[%c0_27, %c0_28, %c0_29] : memref<1x128x128xf32, #tpu.memory_space<vmem>>, vector<1x128x128xf32>
      %49 = vector.shape_cast %48 : vector<1x128x128xf32> to vector<128x128xf32>
      %cst_30 = arith.constant dense<0.000000e+00> : vector<128x128xf32>
      %50 = tpu.matmul %43, %49, %cst_30 {dimension_numbers = #tpu.dot_dimension_numbers<[1], [0], [0], [1], [0, 0, 1, 1], [], []>} : vector<128x128xf32>, vector<128x128xf32>, vector<128x128xf32> -> vector<128x128xf32>
      %51 = arith.addf %47, %50 : vector<128x128xf32>
      %c0_31 = arith.constant 0 : index
      %c0_32 = arith.constant 0 : index
      %c0_33 = arith.constant 0 : index
      %52 = vector.load %arg7[%c0_31, %c0_32, %c0_33] : memref<1x1x128xf32, #tpu.memory_space<vmem>>, vector<1x1x128xf32>
      %53 = vector.shape_cast %52 : vector<1x1x128xf32> to vector<1x128xf32>
      %54 = vector.broadcast %53 : vector<1x128xf32> to vector<128x128xf32>
      %55 = arith.addf %51, %54 : vector<128x128xf32>
      %cst_34 = arith.constant 0.000000e+00 : f32
      %56 = vector.broadcast %cst_34 : f32 to vector<128x128xf32>
      %57 = arith.maximumf %55, %56 : vector<128x128xf32>
      %c2_i32_35 = arith.constant 2 : i32
      %c0_i32_36 = arith.constant 0 : i32
      %58 = arith.cmpi eq, %c2_i32_35, %c0_i32_36 : i32
      %c1_i32_37 = arith.constant 1 : i32
      %59 = arith.select %58, %c1_i32_37, %c2_i32_35 : i32
      %60 = arith.remsi %arg0, %59 : i32
      %c0_i32_38 = arith.constant 0 : i32
      %61 = arith.cmpi ne, %60, %c0_i32_38 : i32
      %c0_i32_39 = arith.constant 0 : i32
      %62 = arith.cmpi slt, %60, %c0_i32_39 : i32
      %c0_i32_40 = arith.constant 0 : i32
      %63 = arith.cmpi slt, %59, %c0_i32_40 : i32
      %64 = arith.xori %62, %63 : i1
      %65 = arith.andi %64, %61 : i1
      %66 = arith.addi %60, %59 : i32
      %67 = arith.select %65, %66, %60 : i32
      %c128_i32_41 = arith.constant 128 : i32
      %68 = arith.muli %67, %c128_i32_41 : i32
      %69 = arith.addi %68, %3 : i32
      %70 = tpu.assume_multiple %69, 128 : i32
      %71 = arith.truncf %57 : vector<128x128xf32> to vector<128x128xbf16>
      %72 = arith.index_cast %70 : i32 to index
      %c0_42 = arith.constant 0 : index
      %73 = vector.load %arg12[%72, %c0_42] : memref<256x128xbf16, #tpu.memory_space<vmem>>, vector<128x128xbf16>
      tpu.vector_store %arg12[%72, %c0_42], %71 {strides = array<i32>} : memref<256x128xbf16, #tpu.memory_space<vmem>>, vector<128x128xbf16>,
      %c0_43 = arith.constant 0 : index
      %c0_44 = arith.constant 0 : index
      %74 = vector.load %arg8[%c0_43, %c0_44] : memref<1x128xf32, #tpu.memory_space<vmem>>, vector<1x128xf32>
      %75 = vector.broadcast %74 : vector<1x128xf32> to vector<128x128xf32>
      %76 = arith.mulf %57, %75 : vector<128x128xf32>
      %cst_45 = arith.constant dense<0.000000e+00> : vector<128xf32>
      %77 = vector.multi_reduction <add>, %76, %cst_45 [1] : vector<128x128xf32> to vector<128xf32>
      %78 = vector.shape_cast %77 : vector<128xf32> to vector<128x1xf32>
      %c0_46 = arith.constant 0 : index
      %c0_47 = arith.constant 0 : index
      %79 = vector.load %arg9[%c0_46, %c0_47] : memref<1x1xf32, #tpu.memory_space<vmem>>, vector<1x1xf32>
      %80 = vector.broadcast %79 : vector<1x1xf32> to vector<128x1xf32>
      %81 = arith.addf %78, %80 : vector<128x1xf32>
      %82 = arith.negf %81 : vector<128x1xf32>
      %83 = math.exp %82 : vector<128x1xf32>
      %cst_48 = arith.constant 1.000000e+00 : f32
      %84 = vector.broadcast %cst_48 : f32 to vector<128x1xf32>
      %85 = arith.addf %84, %83 : vector<128x1xf32>
      %86 = arith.divf %84, %85 : vector<128x1xf32>
      %87 = vector.shape_cast %86 : vector<128x1xf32> to vector<128x1xf32>
      %88 = vector.broadcast %87 : vector<128x1xf32> to vector<128x128xf32>
      %c0_49 = arith.constant 0 : index
      %c0_50 = arith.constant 0 : index
      %89 = vector.load %arg10[%c0_49, %c0_50] : memref<128x128xf32, #tpu.memory_space<vmem>>, vector<128x128xf32>
      tpu.vector_store %arg10[%c0_49, %c0_50], %88 {strides = array<i32>} : memref<128x128xf32, #tpu.memory_space<vmem>>, vector<128x128xf32>,
    } else {
    }
    return
  }
  func.func @transform_0(%arg0: i32, %arg1: i32, %arg2: i32) -> (i32, i32) {
    %c0_i32 = arith.constant 0 : i32
    return %arg1, %arg2 : i32, i32
  }
  func.func @transform_1(%arg0: i32, %arg1: i32, %arg2: i32) -> (i32, i32) {
    %c0_i32 = arith.constant 0 : i32
    %c0_i32_0 = arith.constant 0 : i32
    %c0_i32_1 = arith.constant 0 : i32
    return %c0_i32, %c0_i32_0 : i32, i32
  }
  func.func @transform_2(%arg0: i32, %arg1: i32, %arg2: i32) -> (i32, i32, i32) {
    %c0_i32 = arith.constant 0 : i32
    %c0_i32_0 = arith.constant 0 : i32
    %c0_i32_1 = arith.constant 0 : i32
    return %arg0, %c0_i32, %c0_i32_0 : i32, i32, i32
  }
  func.func @transform_3(%arg0: i32, %arg1: i32, %arg2: i32) -> (i32, i32, i32) {
    %c0_i32 = arith.constant 0 : i32
    %c0_i32_0 = arith.constant 0 : i32
    %c0_i32_1 = arith.constant 0 : i32
    return %arg0, %c0_i32, %c0_i32_0 : i32, i32, i32
  }
  func.func @transform_4(%arg0: i32, %arg1: i32, %arg2: i32) -> (i32, i32, i32) {
    %c0_i32 = arith.constant 0 : i32
    %c0_i32_0 = arith.constant 0 : i32
    %c0_i32_1 = arith.constant 0 : i32
    return %arg0, %c0_i32, %c0_i32_0 : i32, i32, i32
  }
  func.func @transform_5(%arg0: i32, %arg1: i32, %arg2: i32) -> (i32, i32) {
    %c0_i32 = arith.constant 0 : i32
    %c0_i32_0 = arith.constant 0 : i32
    %c0_i32_1 = arith.constant 0 : i32
    return %c0_i32, %c0_i32_0 : i32, i32
  }
  func.func @transform_6(%arg0: i32, %arg1: i32, %arg2: i32) -> (i32, i32) {
    %c0_i32 = arith.constant 0 : i32
    %c0_i32_0 = arith.constant 0 : i32
    %c0_i32_1 = arith.constant 0 : i32
    return %c0_i32, %c0_i32_0 : i32, i32
  }
  func.func @transform_7(%arg0: i32, %arg1: i32, %arg2: i32) -> (i32, i32) {
    %c0_i32 = arith.constant 0 : i32
    %c0_i32_0 = arith.constant 0 : i32
    return %arg1, %c0_i32 : i32, i32
  }
}

</mosaic_0001>

<bundles_post_ra>
// kernel: my_graph_sage_forward.1
= control target key start
LH: loop header
LB: loop body
LE: loop exit
PB: predicated region body
PF: predicated region fallthrough
CT: control target
= control target key end

     0   :  { %s2286_s26 = smov 0   ;;  %s2288_s27 = smov 0   ;;  %s2748_s0 = inlined_call_operand.vmem [shape: bf16[128,128], index: 0, kind: input, shape index: {}]   ;;  %s2749_s1 = inlined_call_operand.vmem [shape: bf16[128,128], index: 1, kind: input, shape index: {}]   ;;  %s2750_s2 = inlined_call_operand.vmem [shape: f32[2,128,128], index: 2, kind: input, shape index: {}]   ;;  %s2751_s3 = inlined_call_operand.vmem [shape: f32[2,128,128], index: 3, kind: input, shape index: {}]   ;;  %s2752_s4 = inlined_call_operand.vmem [shape: f32[2,1,128], index: 4, kind: input, shape index: {}]   ;;  %s2753_s5 = inlined_call_operand.vmem [shape: f32[1,128], index: 5, kind: input, shape index: {}]   ;;  %s2754_s6 = inlined_call_operand.<no memory space> [shape: f32[1,1], index: 6, kind: input, shape index: {}]   ;;  %s2755_s7 = inlined_call_operand.vmem [shape: f32[128,128], index: 7, kind: output, shape index: {}]  }
   0x1   :  { %v12_v0 = vstv %s2754_s6  ;;  %s2290_s28 = smov 0  }
   0x2   :  { %13 = vst [vmem:[#allocation4] sm:$0x1] %v12_v0 }
   0x3 LB: > { %s38_s6 = sadd.s32 1, %s2236_s27  ;;  %p1694_p0 = scmp.ge.s32.totalorder %s2240_s28, 1  ;;  %s2240_s28 = sphi %s2290_s28, %s19_s28   ;;  %s2236_s27 = sphi %s2288_s27, %s2759_s27   ;;  %s2232_s26 = sphi %s2286_s26, %s2758_s26  }
   0x4   : > { %p40_p1 = scmp.ge.s32.totalorder %s38_s6, 2  ;;  %p292_p2 = scmp.lt.s32.totalorder %s2240_s28, 3 }
   0x6   : > { %s2761_s6 = smov (%p40_p1, %s38_s6), 0  ;;  %p293_p3 = pnand %p1694_p0, %p292_p2 }
   0x7   : > { %s371_s29 = sadd.s32 (!%p293_p3), 1, %s2232_s26  ;;  %p384_p5 = scmp.eq.s32.totalorder (!%p293_p3), %s2232_s26, 0  ;;  %v2146_v1 = vld [vmem:[%s2748_s0] sm:$0xff] (!%p293_p3)   ;;  %v413_v5 = vld [vmem:[%s2749_s1 + $0x8] sm:$0xf] (!%p293_p3) }
   0x8   : > { %296 = sbr.rel (%p293_p3) target bundleno = 836 (0x344), region = 48  ;;  %p372_p4 = scmp.lt.s32.totalorder (!%p293_p3), %s371_s29, 0  ;;  %1879 = vmatprep.mubr.bf16.mxu0 (!%p293_p3), %v2146_v1  ;;  %v411_v3 = vld [vmem:[%s2749_s1] sm:$0xf] (!%p293_p3)  ;;  %v412_v4 = vld [vmem:[%s2749_s1 + $0x4] sm:$0xf] (!%p293_p3) }
   0x9   : > { %s373_s30 = ssub.s32 (!%p293_p3), 0, %s371_s29  ;;  %p349_p7 = scmp.lt.s32.totalorder (!%p293_p3), %s2232_s26, 1  ;;  %v414_v6 = vld [vmem:[%s2749_s1 + $0xc] sm:$0xf] (!%p293_p3)  ;;  %v415_v15 = vld [vmem:[%s2749_s1 + $0x10] sm:$0xf] (!%p293_p3) }
   0xa   : > { %s1699_s8 = smin.u32 (!%p293_p3), %s373_s30, %s371_s29  ;;  %v416_v16 = vld [vmem:[%s2749_s1 + $0x14] sm:$0xf] (!%p293_p3)  ;;  %v417_v30 = vld [vmem:[%s2749_s1 + $0x18] sm:$0xf] (!%p293_p3)  ;;  %v418_v31 = vld [vmem:[%s2749_s1 + $0x1c] sm:$0xf] (!%p293_p3) }
   0xb   : > { %s375_s9 = sand.u32 (!%p293_p3), 1, %s1699_s8   ;;  %v419_v42 = vld [vmem:[%s2749_s1 + $0x20] sm:$0xf] (!%p293_p3)  ;;  %v420_v43 = vld [vmem:[%s2749_s1 + $0x24] sm:$0xf] (!%p293_p3)  ;;  %s1273_s11 = ssub.s32 (!%p293_p3), 0, %s2232_s26 }
   0xc   : > { %s376_s12 = ssub.s32 (!%p293_p3), 0, %s375_s9  ;;  %v779_v49 = vld [vmem:[%s2749_s1] sm:$0xf] (!%p293_p3)  ;;  %v421_v56 = vld [vmem:[%s2749_s1 + $0x28] sm:$0xf] (!%p293_p3)  ;;  %p1272_p8 = scmp.lt.s32.totalorder (!%p293_p3), %s2232_s26, 0 }
   0xd   : > { %v422_v57 = vld [vmem:[%s2749_s1 + $0x2c] sm:$0xf] (!%p293_p3) }
   0xf   : > { %s2763_s12 = smov (!%p372_p4, %s376_s12), %s375_s9 }
  0x10   : > { %s439_s13 = scalar_select %p384_p5, 1, 0 }
  0x11   : > { %p1701_p6 = scmp.lt.s32.totalorder %s2763_s12, 0  ;;  %s382_s14 = sadd.s32 2, %s2763_s12 }
  0x12   : > { %v440_v2 = vstv %s439_s13  ;;  %s2334_s30 = scalar_select %p349_p7, %s2232_s26, 1 }
  0x13   : > { %s2765_s14 = smov (!%p1701_p6, %s382_s14), %s2763_s12  ;;  %vm2327_vm0 = vcmp.eq.s32.totalorder %v440_v2, 1 }
  0x14   : > { %s1702_s15 = sshll.u32 %s2765_s14, 7  ;;  %s1781_s12 = sshll.u32 %s2334_s30, 7 }
  0x15   : > { %s427_s16 = sshra.s32 %s1702_s15, 4  ;;  %s2370_s15 = scalar_lea.vmem %s2751_s3, %s1781_s12 }
  0x16   : > { %s1703_s21 = sshll.u32 %s427_s16, 3  ;;  %v927_v33 = vld [vmem:[%s2370_s15] sm:$0xff]  ;;  %v928_v34 = vld [vmem:[%s2370_s15 + $0x8] sm:$0xff]  ;;  %v929_v36 = vld [vmem:[%s2370_s15 + $0x10] sm:$0xff]  ;;  %s2484_s23 = scalar_lea.vmem %s2750_s2, %s1781_s12 }
  0x17   : > { %s2324_s29 = scalar_lea.vmem [#allocation3], %s1703_s21  ;;  %v930_v37 = vld [vmem:[%s2370_s15 + $0x18] sm:$0xff]  ;;  %v2007_v45 = vpack.c.bf16 %v928_v34, %v927_v33  ;;  %v931_v47 = vld [vmem:[%s2370_s15 + $0x20] sm:$0xff]  ;;  %v932_v48 = vld [vmem:[%s2370_s15 + $0x28] sm:$0xff]  ;;  %s361_s18 = scalar_lea.vmem %s2752_s4, %s2334_s30 }
  0x18   : > { %v431_v7 = vld [vmem:[%s2324_s29] sm:$0xff]  ;;  %v432_v9 = vld [vmem:[%s2324_s29 + $0x8] sm:$0xff]  ;;  %v433_v10 = vld [vmem:[%s2324_s29 + $0x10] sm:$0xff]  ;;  %v2011_v46 = vpack.c.bf16 %v930_v37, %v929_v36  ;;  %v2015_v58 = vpack.c.bf16 %v932_v48, %v931_v47 }
  0x19   : > { %v1704_v11 = vcombine.low %v431_v7, %v431_v7  ;;  %v2336_v12 = vcombine.high %v431_v7, %v431_v7  ;;  %v2338_v13 = vcombine.low %v432_v9, %v432_v9  ;;  %v2340_v14 = vcombine.high %v432_v9, %v432_v9  ;;  %v434_v19 = vld [vmem:[%s2324_s29 + $0x18] sm:$0xff]  ;;  %v435_v32 = vld [vmem:[%s2324_s29 + $0x20] sm:$0xff]  ;;  %v436_v44 = vld [vmem:[%s2324_s29 + $0x28] sm:$0xff]  ;;  %2008 = vmatprep.subr.bf16.mxu1 %v2007_v45 }
  0x1a   : > { %v2348_v17 = vcombine.low %v433_v10, %v433_v10  ;;  %v2350_v18 = vcombine.high %v433_v10, %v433_v10  ;;  %v2378_v28 = vcombine.low %v434_v19, %v434_v19  ;;  %v2380_v29 = vcombine.high %v434_v19, %v434_v19  ;;  %v437_v55 = vld [vmem:[%s2324_s29 + $0x30] sm:$0xff]  ;;  %2010 = vmatpush3.bf16.msra.mxu1 %v2007_v45  ;;  %v934_v61 = vld [vmem:[%s2370_s15 + $0x38] sm:$0xff]  ;;  %v935_v9 = vld [vmem:[%s2370_s15 + $0x40] sm:$0xff] }
  0x1b   : > { %v498_v20 = vsel %vm2327_vm0, %v411_v3, %v1704_v11  ;;  %v499_v21 = vsel %vm2327_vm0, %v412_v4, %v2336_v12  ;;  %v500_v22 = vsel %vm2327_vm0, %v413_v5, %v2338_v13  ;;  %v501_v23 = vsel %vm2327_vm0, %v414_v6, %v2340_v14  ;;  %2012 = vmatprep.subr.bf16.mxu1 %v2011_v46  ;;  %v933_v60 = vld [vmem:[%s2370_s15 + $0x30] sm:$0xff]  ;;  %v438_v6 = vld [vmem:[%s2324_s29 + $0x38] sm:$0xff]  ;;  %v936_v10 = vld [vmem:[%s2370_s15 + $0x48] sm:$0xff] }
  0x1c   : > { %v1728_v24 = vcombine.low %v498_v20, %v499_v21  ;;  %v1729_v25 = vcombine.low %v500_v22, %v501_v23  ;;  %v502_v26 = vsel %vm2327_vm0, %v415_v15, %v2348_v17  ;;  %v503_v27 = vsel %vm2327_vm0, %v416_v16, %v2350_v18  ;;  %v423_v4 = vld [vmem:[%s2749_s1 + $0x30] sm:$0xf]  ;;  %v424_v5 = vld [vmem:[%s2749_s1 + $0x34] sm:$0xf]  ;;  %v425_v21 = vld [vmem:[%s2749_s1 + $0x38] sm:$0xf] }
  0x1d   : > { %v1730_v35 = vcombine.low %v502_v26, %v503_v27  ;;  %v504_v38 = vsel %vm2327_vm0, %v417_v30, %v2378_v28  ;;  %v505_v39 = vsel %vm2327_vm0, %v418_v31, %v2380_v29  ;;  %v2399_v40 = vcombine.low %v435_v32, %v435_v32  ;;  %v426_v22 = vld [vmem:[%s2749_s1 + $0x3c] sm:$0xf]  ;;  %v940_v33 = vld [vmem:[%s2370_s15 + $0x68] sm:$0xff]  ;;  %v780_v47 = vld [vmem:[%s2749_s1 + $0x4] sm:$0xf] }
  0x1e   : > { %1863 = vmatprep.subr.bf16.mxu0 %v1728_v24  ;;  %v2401_v41 = vcombine.high %v435_v32, %v435_v32  ;;  %v1731_v50 = vcombine.low %v504_v38, %v505_v39  ;;  %v2421_v53 = vcombine.low %v436_v44, %v436_v44  ;;  %v2423_v54 = vcombine.high %v436_v44, %v436_v44  ;;  %v939_v32 = vld [vmem:[%s2370_s15 + $0x60] sm:$0xff]  ;;  %v912_v36 = vld [vmem:[%s2484_s23 + $0x8] sm:$0xff]  ;;  %v941_v38 = vld [vmem:[%s2370_s15 + $0x70] sm:$0xff] }
  0x1f   : > { %1864 = vmatpush3.bf16.msra.mxu0 %v1728_v24  ;;  %v506_v51 = vsel %vm2327_vm0, %v419_v42, %v2399_v40  ;;  %v863_v59 = vsel %vm2327_vm0, %v779_v49, %v1704_v11  ;;  %v2436_v0 = vcombine.low %v437_v55, %v437_v55  ;;  %v2444_v3 = vcombine.high %v437_v55, %v437_v55  ;;  %v937_v24 = vld [vmem:[%s2370_s15 + $0x50] sm:$0xff]  ;;  %v942_v39 = vld [vmem:[%s2370_s15 + $0x78] sm:$0xff]  ;;  %v2147_v45 = vld [vmem:[%s2748_s0 + $0x8] sm:$0xff]  }
  0x20   : > { %1865 = vmatprep.subr.bf16.mxu0 %v1729_v25  ;;  %v507_v52 = vsel %vm2327_vm0, %v420_v43, %v2401_v41  ;;  %v879_v62 = vunpack.c.l.bf16 %v863_v59  ;;  %v508_v1 = vsel %vm2327_vm0, %v421_v56, %v2421_v53  ;;  %v509_v2 = vsel %vm2327_vm0, %v422_v57, %v2423_v54  ;;  %2014 = vmatpush3.bf16.msra.mxu1 %v2011_v46  ;;  %v913_v43 = vld [vmem:[%s2484_s23 + $0x10] sm:$0xff]  ;;  %v914_v44 = vld [vmem:[%s2484_s23 + $0x18] sm:$0xff]  ;;  %v781_v49 = vld [vmem:[%s2749_s1 + $0x8] sm:$0xf] }
  0x21   : > { %v1732_v63 = vcombine.low %v506_v51, %v507_v52  ;;  %2016 = vmatprep.subr.bf16.mxu1 %v2015_v58  ;;  %v2019_v7 = vpack.c.bf16 %v934_v61, %v933_v60  ;;  %v1733_v11 = vcombine.low %v508_v1, %v509_v2  ;;  %v510_v15 = vsel %vm2327_vm0, %v423_v4, %v2436_v0  ;;  %v2148_v48 = vld [vmem:[%s2748_s0 + $0x10] sm:$0xff]   ;;  %v915_v51 = vld [vmem:[%s2484_s23 + $0x20] sm:$0xff]  ;;  %v916_v52 = vld [vmem:[%s2484_s23 + $0x28] sm:$0xff] }
  0x22   : > { %1927 = vmatprep.mubr.f32.mxu1 %v879_v62  ;;  %v511_v16 = vsel %vm2327_vm0, %v424_v5, %v2444_v3  ;;  %v2461_v19 = vcombine.low %v438_v6, %v438_v6  ;;  %v2463_v20 = vcombine.high %v438_v6, %v438_v6  ;;  %v2023_v23 = vpack.c.bf16 %v936_v10, %v935_v9  ;;  %v782_v57 = vld [vmem:[%s2749_s1 + $0xc] sm:$0xf]  ;;  %v918_v61 = vld [vmem:[%s2484_s23 + $0x38] sm:$0xff]  ;;  %v784_v2 = vld [vmem:[%s2749_s1 + $0x14] sm:$0xf] }
  0x23   : > { %1866 = vmatpush3.bf16.msra.mxu0 %v1729_v25  ;;  %v938_v25 = vld [vmem:[%s2370_s15 + $0x58] sm:$0xff]  ;;  %v1734_v26 = vcombine.low %v510_v15, %v511_v16  ;;  %v2031_v37 = vpack.c.bf16 %v940_v33, %v939_v32  ;;  %v2035_v46 = vpack.c.bf16 %v942_v39, %v941_v38  ;;  %v864_v55 = vsel %vm2327_vm0, %v780_v47, %v2336_v12  ;;  %v917_v12 = vld [vmem:[%s2484_s23 + $0x30] sm:$0xff]  ;;  %v2150_v4 = vld [vmem:[%s2748_s0 + $0x20] sm:$0xff]  }
  0x24   : > { %1867 = vmatprep.subr.bf16.mxu0 %v1730_v35  ;;  %2018 = vmatpush3.bf16.msra.mxu1 %v2015_v58  ;;  %v512_v27 = vsel %vm2327_vm0, %v425_v21, %v2461_v19  ;;  %v513_v30 = vsel %vm2327_vm0, %v426_v22, %v2463_v20  ;;  %v2027_v31 = vpack.c.bf16 %v938_v25, %v937_v24  ;;  %v783_v58 = vld [vmem:[%s2749_s1 + $0x10] sm:$0xf]  ;;  %v880_v60 = vunpack.c.l.bf16 %v864_v55  ;;  %v922_v22 = vld [vmem:[%s2484_s23 + $0x58] sm:$0xff]  ;;  %v923_v25 = vld [vmem:[%s2484_s23 + $0x60] sm:$0xff] }
  0x25   : > { %2020 = vmatprep.subr.bf16.mxu1 %v2019_v7  ;;  %v1735_v34 = vcombine.low %v512_v27, %v513_v30  ;;  %v865_v56 = vsel %vm2327_vm0, %v781_v49, %v2338_v13  ;;  %v2047_v59 = vpack.c.bf16 %v916_v52, %v915_v51  ;;  %v866_v13 = vsel %vm2327_vm0, %v782_v57, %v2340_v14  ;;  %v785_v14 = vld [vmem:[%s2749_s1 + $0x18] sm:$0xf]  ;;  %v921_v21 = vld [vmem:[%s2484_s23 + $0x50] sm:$0xff]  ;;  %v788_v39 = vld [vmem:[%s2749_s1 + $0x24] sm:$0xf] }
  0x26   : > { %v881_v62 = vunpack.c.l.bf16 %v865_v56  ;;  %v867_v1 = vsel %vm2327_vm0, %v783_v58, %v2348_v17  ;;  %v2051_v5 = vpack.c.bf16 %v918_v61, %v917_v12  ;;  %v882_v6 = vunpack.c.l.bf16 %v866_v13  ;;  %v920_v17 = vld [vmem:[%s2484_s23 + $0x48] sm:$0xff]  ;;  %v925_v30 = vld [vmem:[%s2484_s23 + $0x70] sm:$0xff]  ;;  %v2153_v32 = vld [vmem:[%s2748_s0 + $0x38] sm:$0xff]  }
  0x27   : > { %1868 = vmatpush3.bf16.msra.mxu0 %v1730_v35  ;;  %v911_v35 = vld [vmem:[%s2484_s23] sm:$0xff]  ;;  %v883_v9 = vunpack.c.l.bf16 %v867_v1  ;;  %v868_v10 = vsel %vm2327_vm0, %v784_v2, %v2350_v18  ;;  %v2151_v18 = vld [vmem:[%s2748_s0 + $0x28] sm:$0xff]   ;;  %v2059_v24 = vpack.c.bf16 %v922_v22, %v921_v21  ;;  %v792_v49 = vld [vmem:[%s2749_s1 + $0x34] sm:$0xf] }
  0x28   : > { %1869 = vmatprep.subr.bf16.mxu0 %v1731_v50  ;;  %2022 = vmatpush3.bf16.msra.mxu1 %v2019_v7  ;;  %v2039_v42 = vpack.c.bf16 %v912_v36, %v911_v35  ;;  %v919_v7 = vld [vmem:[%s2484_s23 + $0x40] sm:$0xff]  ;;  %v884_v16 = vunpack.c.l.bf16 %v868_v10  ;;  %v793_v52 = vld [vmem:[%s2749_s1 + $0x38] sm:$0xf]  ;;  %v794_v55 = vld [vmem:[%s2749_s1 + $0x3c] sm:$0xf] }
  0x29   : > { %2024 = vmatprep.subr.bf16.mxu1 %v2023_v23  ;;  %v2055_v15 = vpack.c.bf16 %v920_v17, %v919_v7  ;;  %v2624_v22 = vld [vmem:[%s361_s18] ss:$0 sm:$0xff] }
  0x2b   : > { %1870 = vmatpush3.bf16.msra.mxu0 %v1731_v50  ;;  %v2043_v50 = vpack.c.bf16 %v914_v44, %v913_v43  ;;  %v872_v43 = vsel %vm2327_vm0, %v788_v39, %v2401_v41  ;;  %v789_v44 = vld [vmem:[%s2749_s1 + $0x28] sm:$0xf] }
  0x2c   : > { %1871 = vmatprep.subr.bf16.mxu0 %v1732_v63  ;;  %2026 = vmatpush3.bf16.msra.mxu1 %v2023_v23 }
  0x2d   : > { %2028 = vmatprep.subr.bf16.mxu1 %v2027_v31 }
  0x2f   : > { %1872 = vmatpush3.bf16.msra.mxu0 %v1732_v63  ;;  %v2149_v63 = vld [vmem:[%s2748_s0 + $0x18] sm:$0xff]  }
  0x30   : > { %1873 = vmatprep.subr.bf16.mxu0 %v1733_v11  ;;  %2030 = vmatpush3.bf16.msra.mxu1 %v2027_v31  ;;  %v926_v31 = vld [vmem:[%s2484_s23 + $0x78] sm:$0xff] }
  0x31   : > { %2032 = vmatprep.subr.bf16.mxu1 %v2031_v37  ;;  %v2067_v33 = vpack.c.bf16 %v926_v31, %v925_v30 }
  0x33   : > { %1874 = vmatpush3.bf16.msra.mxu0 %v1733_v11  ;;  %v869_v11 = vsel %vm2327_vm0, %v785_v14, %v2378_v28  ;;  %v2152_v28 = vld [vmem:[%s2748_s0 + $0x30] sm:$0xff]  }
  0x34   : > { %1875 = vmatprep.subr.bf16.mxu0 %v1734_v26  ;;  %2034 = vmatpush3.bf16.msra.mxu1 %v2031_v37  ;;  %v885_v23 = vunpack.c.l.bf16 %v869_v11  ;;  %v787_v37 = vld [vmem:[%s2749_s1 + $0x20] sm:$0xf] }
  0x35   : > { %2036 = vmatprep.subr.bf16.mxu1 %v2035_v46  ;;  %v871_v38 = vsel %vm2327_vm0, %v787_v37, %v2399_v40  ;;  %v873_v40 = vsel %vm2327_vm0, %v789_v44, %v2421_v53 }
  0x37   : > { %1876 = vmatpush3.bf16.msra.mxu0 %v1734_v26  ;;  %v924_v26 = vld [vmem:[%s2484_s23 + $0x68] sm:$0xff]  ;;  %s1754_s23 = smin.u32 %s2232_s26, %s1273_s11 }
  0x38   : > { %1877 = vmatprep.subr.bf16.mxu0 %v1735_v34  ;;  %2038 = vmatpush3.bf16.msra.mxu1 %v2035_v46  ;;  %v2063_v27 = vpack.c.bf16 %v924_v26, %v923_v25  ;;  %v889_v46 = vunpack.c.l.bf16 %v873_v40  ;;  %s1275_s13 = sand.u32 1, %s1754_s23  }
  0x39   : > { %2071 = vmatprep.subr.bf16.mxu1 %v2039_v42  ;;  %s1276_s14 = ssub.s32 0, %s1275_s13 }
  0x3a   : > { %s2767_s14 = smov (!%p1272_p8, %s1276_s14), %s1275_s13 }
  0x3b   : > { %1878 = vmatpush3.bf16.msra.mxu0 %v1735_v34  ;;  %1928 = vmatmul.mubr.f32.vlgmr.msra.gmra.mrb[0].mxu1 %v880_v60  ;;  %v786_v34 = vld [vmem:[%s2749_s1 + $0x1c] sm:$0xf]  ;;  %p1756_p9 = scmp.lt.s32.totalorder %s2767_s14, 0  ;;  %s1282_s16 = sadd.s32 2, %s2767_s14 }
  0x3c   : > { %2040 = vmatprep.subr.bf16.mxu0 %v2039_v42  ;;  %2079 = vmatpush3.bf16.msra.mxu1 %v2039_v42  ;;  %v870_v35 = vsel %vm2327_vm0, %v786_v34, %v2380_v29  ;;  %v888_v29 = vunpack.c.l.bf16 %v872_v43 }
  0x3d   : > { %1930 = vmatprep.mubr.f32.mxu1 %v881_v62  ;;  %2072 = vmatprep.subr.bf16.mxu1 %v2043_v50  ;;  %v886_v36 = vunpack.c.l.bf16 %v870_v35  ;;  %s2769_s16 = smov (!%p1756_p9, %s1282_s16), %s2767_s14 }
  0x3e   : > { %1880 = vmatmul.mubr.bf16.vlgmr.msra.gmra.mrb[0].mxu0 %v2147_v45  ;;  %v790_v45 = vld [vmem:[%s2749_s1 + $0x2c] sm:$0xf]  ;;  %s1757_s19 = sshll.u32 %s2769_s16, 7 }
  0x3f   : > { %1883 = vmatprep.mubr.bf16.mxu0 %v2148_v48  ;;  %2042 = vmatpush3.bf16.msra.mxu0 %v2039_v42  ;;  %v887_v42 = vunpack.c.l.bf16 %v871_v38  ;;  %v874_v41 = vsel %vm2327_vm0, %v790_v45, %v2423_v54  ;;  %v791_v48 = vld [vmem:[%s2749_s1 + $0x30] sm:$0xf]  ;;  %v876_v54 = vsel %vm2327_vm0, %v792_v49, %v2444_v3  ;;  %v878_v3 = vsel %vm2327_vm0, %v794_v55, %v2463_v20  ;;  %s1294_s20 = sshra.s32 %s1757_s19, 4 }
  0x40   : > { %2044 = vmatprep.subr.bf16.mxu0 %v2043_v50  ;;  %1931 = vmatmul.mubr.f32.gmra.mrb[2].mxu1 %v882_v6  ;;  %v890_v47 = vunpack.c.l.bf16 %v874_v41  ;;  %v875_v53 = vsel %vm2327_vm0, %v791_v48, %v2436_v0  ;;  %v892_v51 = vunpack.c.l.bf16 %v876_v54  ;;  %v877_v0 = vsel %vm2327_vm0, %v793_v52, %v2461_v19  ;;  %s1758_s26 = sshll.u32 %s1294_s20, 3 }
  0x41   : > { %2080 = vmatpush3.bf16.msra.mxu1 %v2043_v50  ;;  %1933 = vmatprep.mubr.f32.mxu1 %v883_v9  ;;  %v893_v56 = vunpack.c.l.bf16 %v877_v0  ;;  %v894_v57 = vunpack.c.l.bf16 %v878_v3  ;;  %s2636_s30 = scalar_lea.vmem [#allocation3], %s1758_s26 }
  0x42   : > { %2073 = vmatprep.subr.bf16.mxu1 %v2047_v59 }
  0x43   : > { %2046 = vmatpush3.bf16.msra.mxu0 %v2043_v50  ;;  %v891_v50 = vunpack.c.l.bf16 %v875_v53 }
  0x44   : > { %2048 = vmatprep.subr.bf16.mxu0 %v2047_v59  ;;  %1934 = vmatmul.mubr.f32.gmra.mrb[4].mxu1 %v884_v16 }
  0x45   : > { %2081 = vmatpush3.bf16.msra.mxu1 %v2047_v59  ;;  %1936 = vmatprep.mubr.f32.mxu1 %v885_v23 }
  0x46   : > { %1884 = vmatmul.mubr.bf16.gmra.mrb[4].mxu0 %v2149_v63  ;;  %2074 = vmatprep.subr.bf16.mxu1 %v2051_v5 }
  0x47   : > { %1887 = vmatprep.mubr.bf16.mxu0 %v2150_v4  ;;  %2050 = vmatpush3.bf16.msra.mxu0 %v2047_v59 }
  0x48   : > { %2052 = vmatprep.subr.bf16.mxu0 %v2051_v5  ;;  %1937 = vmatmul.mubr.f32.gmra.mrb[6].mxu1 %v886_v36 }
  0x49   : > { %2082 = vmatpush3.bf16.msra.mxu1 %v2051_v5  ;;  %1939 = vmatprep.mubr.f32.mxu1 %v887_v42 }
  0x4a   : > { %2075 = vmatprep.subr.bf16.mxu1 %v2055_v15 }
  0x4b   : > { %2054 = vmatpush3.bf16.msra.mxu0 %v2051_v5 }
  0x4c   : > { %2056 = vmatprep.subr.bf16.mxu0 %v2055_v15  ;;  %1940 = vmatmul.mubr.f32.gmra.mrb[8].mxu1 %v888_v29 }
  0x4d   : > { %2083 = vmatpush3.bf16.msra.mxu1 %v2055_v15  ;;  %1942 = vmatprep.mubr.f32.mxu1 %v889_v46 }
  0x4e   : > { %1888 = vmatmul.mubr.bf16.gmra.mrb[8].mxu0 %v2151_v18  ;;  %2076 = vmatprep.subr.bf16.mxu1 %v2059_v24 }
  0x4f   : > { %1891 = vmatprep.mubr.bf16.mxu0 %v2152_v28  ;;  %2058 = vmatpush3.bf16.msra.mxu0 %v2055_v15 }
  0x50   : > { %2060 = vmatprep.subr.bf16.mxu0 %v2059_v24  ;;  %1943 = vmatmul.mubr.f32.gmra.mrb[10].mxu1 %v890_v47 }
  0x51   : > { %2084 = vmatpush3.bf16.msra.mxu1 %v2059_v24  ;;  %1945 = vmatprep.mubr.f32.mxu1 %v891_v50 }
  0x52   : > { %2077 = vmatprep.subr.bf16.mxu1 %v2063_v27 }
  0x53   : > { %2062 = vmatpush3.bf16.msra.mxu0 %v2059_v24 }
  0x54   : > { %2064 = vmatprep.subr.bf16.mxu0 %v2063_v27  ;;  %1946 = vmatmul.mubr.f32.gmra.mrb[12].mxu1 %v892_v51 }
  0x55   : > { %2085 = vmatpush3.bf16.msra.mxu1 %v2063_v27  ;;  %1948 = vmatprep.mubr.f32.mxu1 %v893_v56 }
  0x56   : > { %1892 = vmatmul.mubr.bf16.gmra.mrb[12].mxu0 %v2153_v32  ;;  %2078 = vmatprep.subr.bf16.mxu1 %v2067_v33 }
  0x57   : > { %2066 = vmatpush3.bf16.msra.mxu0 %v2063_v27  ;;  %v2631_v27 = vld [vmem:[%s2753_s5] ss:$0 sm:$0xff] }
  0x58   : > { %2068 = vmatprep.subr.bf16.mxu0 %v2067_v33  ;;  %1949 = vmatmul.mubr.f32.gmra.mrb[14].mxu1 %v894_v57 }
  0x59   : > { %2086 = vmatpush3.bf16.msra.mxu1 %v2067_v33 }
  0x5b   : > { %2070 = vmatpush3.bf16.msra.mxu0 %v2067_v33 }
 0x10e   : > { %v1929_v19 = vpop.f32.mrb[0].mxu1 }
 0x10f   : > { %v1009_v61 = vpop.f32.mrb[1].mxu1 }
 0x111   : > { %v1881_v58 = vpop.f32.mrb[0].mxu0 }
 0x112   : > { %v676_v59 = vpop.f32.mrb[1].mxu0 }
 0x113   : > { %v1882_v60 = vpop.f32.mrb[2].mxu0  ;;  %1983 = vmatprep.mubr.f32.mxu0 %v676_v59  ;;  %v1932_v1 = vpop.f32.mrb[2].mxu1 }
 0x114   : > { %v679_v12 = vpop.f32.mrb[3].mxu0  ;;  %v1019_v9 = vpop.f32.mrb[3].mxu1 }
 0x115   : > { %1984 = vmatmul.mubr.f32.vlgmr.msra.gmra.mrb[16].mxu0 %v679_v12 }
 0x116   : > { %1986 = vmatprep.mubr.f32.mxu0 %v1881_v58 }
 0x117   : > { %v1935_v10 = vpop.f32.mrb[4].mxu1 }
 0x118   : > { %v1029_v11 = vpop.f32.mrb[5].mxu1 }
 0x119   : > { %v1885_v62 = vpop.f32.mrb[4].mxu0  ;;  %1987 = vmatmul.mubr.f32.gmra.mrb[18].mxu0 %v1882_v60 }
 0x11a   : > { %v692_v13 = vpop.f32.mrb[5].mxu0 }
 0x11b   : > { %v1886_v63 = vpop.f32.mrb[6].mxu0  ;;  %1989 = vmatprep.mubr.f32.mxu0 %v692_v13  ;;  %v1938_v15 = vpop.f32.mrb[6].mxu1 }
 0x11c   : > { %v695_v8 = vpop.f32.mrb[7].mxu0  ;;  %v1039_v16 = vpop.f32.mrb[7].mxu1 }
 0x11d   : > { %1990 = vmatmul.mubr.f32.gmra.mrb[20].mxu0 %v695_v8 }
 0x11e   : > { %1992 = vmatprep.mubr.f32.mxu0 %v1885_v62 }
 0x121   : > { %v1889_v20 = vpop.f32.mrb[8].mxu0  ;;  %1993 = vmatmul.mubr.f32.gmra.mrb[22].mxu0 %v1886_v63 }
 0x122   : > { %v708_v2 = vpop.f32.mrb[9].mxu0 }
 0x123   : > { %v1890_v4 = vpop.f32.mrb[10].mxu0  ;;  %1995 = vmatprep.mubr.f32.mxu1 %v708_v2 }
 0x124   : > { %v711_v14 = vpop.f32.mrb[11].mxu0 }
 0x125   : > { %1996 = vmatmul.mubr.f32.vlgmr.msra.gmra.mrb[8].mxu1 %v711_v14 }
 0x126   : > { %1998 = vmatprep.mubr.f32.mxu1 %v1889_v20 }
 0x129   : > { %v1893_v5 = vpop.f32.mrb[12].mxu0  ;;  %1999 = vmatmul.mubr.f32.gmra.mrb[10].mxu1 %v1890_v4 }
 0x12a   : > { %v724_v6 = vpop.f32.mrb[13].mxu0 }
 0x12b   : > { %v1894_v7 = vpop.f32.mrb[14].mxu0  ;;  %2001 = vmatprep.mubr.f32.mxu1 %v724_v6 }
 0x12c   : > { %v727_v17 = vpop.f32.mrb[15].mxu0 }
 0x12d   : > { %2002 = vmatmul.mubr.f32.gmra.mrb[12].mxu1 %v727_v17 }
 0x12e   : > { %2004 = vmatprep.mubr.f32.mxu1 %v1893_v5 }
 0x131   : > { %2005 = vmatmul.mubr.f32.gmra.mrb[14].mxu1 %v1894_v7 }
 0x1e8   : > { %v1985_v21 = vpop.f32.mrb[16].mxu0 }
 0x1e9   : > { %v1160_v23 = vadd.f32 %v1985_v21, %v1929_v19  ;;  %v1154_v18 = vpop.f32.mrb[17].mxu0 }
 0x1ea   : > { %v1155_v28 = vadd.f32 %v1154_v18, %v1009_v61 }
 0x1eb   : > { %v1241_v24 = vadd.f32 %v2624_v22, %v1160_v23 }
 0x1ec   : > { %v1240_v25 = vadd.f32 %v2624_v22, %v1155_v28  ;;  %v1988_v26 = vpop.f32.mrb[18].mxu0 }
 0x1ed   : > { %v1170_v30 = vadd.f32 %v1988_v26, %v1932_v1  ;;  %v1164_v31 = vpop.f32.mrb[19].mxu0  ;;  %v1257_v32 = vmax.f32 %v1241_v24, 0.0 }
 0x1ee   : > { %v1256_v33 = vmax.f32 %v1240_v25, 0.0  ;;  %v1165_v34 = vadd.f32 %v1164_v31, %v1019_v9 }
 0x1ef   : > { %v1314_v35 = vmul.f32 %v2631_v27, %v1257_v32  ;;  %v1243_v36 = vadd.f32 %v2624_v22, %v1170_v30 }
 0x1f0   : > { %v1242_v37 = vadd.f32 %v2624_v22, %v1165_v34  ;;  %v1991_v38 = vpop.f32.mrb[20].mxu0  ;;  %v1286_v39 = vpack.c.bf16 %v1257_v32, %v1256_v33  ;;  %v1313_v41 = vmul.f32 %v2631_v27, %v1256_v33 }
 0x1f1   : > { %v1180_v42 = vadd.f32 %v1991_v38, %v1935_v10  ;;  %1331 = vadd.xlane.f32.xlu0 %v1314_v35  ;;  %v1174_v43 = vpop.f32.mrb[21].mxu0  ;;  %v1259_v29 = vmax.f32 %v1243_v36, 0.0 }
 0x1f2   : > { %v1258_v44 = vmax.f32 %v1242_v37, 0.0  ;;  %1298 = vst [vmem:[%s2636_s30] sm:$0xff] %v1286_v39  ;;  %v1175_v40 = vadd.f32 %v1174_v43, %v1029_v11  ;;  %v2673_v43 = vld [vmem:[#allocation4] ss:$0 sm:$0xff] }
 0x1f3   : > { %v1245_v45 = vadd.f32 %v2624_v22, %v1180_v42  ;;  %v1316_v46 = vmul.f32 %v2631_v27, %v1259_v29  ;;  %v2242_v42 = vmov 0  }
 0x1f4   : > { %v1244_v47 = vadd.f32 %v2624_v22, %v1175_v40  ;;  %v1994_v48 = vpop.f32.mrb[22].mxu0  ;;  %v1287_v53 = vpack.c.bf16 %v1259_v29, %v1258_v44  ;;  %v1315_v55 = vmul.f32 %v2631_v27, %v1258_v44  ;;  %2128 = vset.pattern.permute.xlu1 %v2242_v42  ;;  %2129 = vset.pattern.permute.xlu0 %v2242_v42 }
 0x1f5   : > { %v1261_v49 = vmax.f32 %v1245_v45, 0.0  ;;  %v1190_v50 = vadd.f32 %v1994_v48, %v1938_v15  ;;  %1335 = vadd.xlane.f32.xlu1 %v1316_v46  ;;  %v1184_v54 = vpop.f32.mrb[23].mxu0  ;;  %1329 = vadd.xlane.f32.xlu0 %v1313_v41 }
 0x1f6   : > { %v1260_v51 = vmax.f32 %v1244_v47, 0.0  ;;  %1299 = vst [vmem:[%s2636_s30 + $0x8] sm:$0xff] %v1287_v53  ;;  %v1185_v52 = vadd.f32 %v1184_v54, %v1039_v16 }
 0x1f7   : > { %v1247_v0 = vadd.f32 %v2624_v22, %v1190_v50  ;;  %v1318_v13 = vmul.f32 %v2631_v27, %v1261_v49 }
 0x1f8   : > { %v1288_v56 = vpack.c.bf16 %v1261_v49, %v1260_v51  ;;  %v1246_v3 = vadd.f32 %v2624_v22, %v1185_v52  ;;  %v1997_v57 = vpop.f32.mrb[8].mxu1  ;;  %v1317_v58 = vmul.f32 %v2631_v27, %v1260_v51 }
 0x1f9   : > { %v1263_v59 = vmax.f32 %v1247_v0, 0.0  ;;  %v1249_v60 = vadd.f32 %v1997_v57, %v2624_v22  ;;  %v1194_v12 = vpop.f32.mrb[9].mxu1  ;;  %1333 = vadd.xlane.f32.xlu1 %v1315_v55 }
 0x1fa   : > { %1300 = vst [vmem:[%s2636_s30 + $0x10] sm:$0xff] %v1288_v56  ;;  %v1262_v19 = vmax.f32 %v1246_v3, 0.0  ;;  %v1248_v61 = vadd.f32 %v2624_v22, %v1194_v12  ;;  %1337 = vadd.xlane.f32.xlu0 %v1317_v58 }
 0x1fb   : > { %v1265_v62 = vmax.f32 %v1249_v60, 0.0  ;;  %v1320_v7 = vmul.f32 %v2631_v27, %v1263_v59 }
 0x1fc   : > { %v1289_v63 = vpack.c.bf16 %v1263_v59, %v1262_v19  ;;  %v1264_v1 = vmax.f32 %v1248_v61, 0.0  ;;  %v2000_v8 = vpop.f32.mrb[10].mxu1  ;;  %v1319_v20 = vmul.f32 %v2631_v27, %v1262_v19 }
 0x1fd   : > { %v1251_v2 = vadd.f32 %v2000_v8, %v2624_v22  ;;  %v1204_v4 = vpop.f32.mrb[11].mxu1  ;;  %1339 = vadd.xlane.f32.xlu1 %v1318_v13  ;;  %v1322_v18 = vmul.f32 %v2631_v27, %v1265_v62 }
 0x1fe   : > { %1301 = vst [vmem:[%s2636_s30 + $0x18] sm:$0xff] %v1289_v63  ;;  %v1290_v14 = vpack.c.bf16 %v1265_v62, %v1264_v1  ;;  %v1250_v5 = vadd.f32 %v2624_v22, %v1204_v4  ;;  %1341 = vadd.xlane.f32.xlu0 %v1319_v20  ;;  %v1321_v10 = vmul.f32 %v2631_v27, %v1264_v1 }
 0x1ff   : > { %v1267_v6 = vmax.f32 %v1251_v2, 0.0 }
 0x200   : > { %1302 = vst [vmem:[%s2636_s30 + $0x20] sm:$0xff] %v1290_v14  ;;  %v1266_v17 = vmax.f32 %v1250_v5, 0.0  ;;  %v2003_v9 = vpop.f32.mrb[12].mxu1 }
 0x201   : > { %v1253_v11 = vadd.f32 %v2003_v9, %v2624_v22  ;;  %v1214_v15 = vpop.f32.mrb[13].mxu1  ;;  %1343 = vadd.xlane.f32.xlu1 %v1320_v7  ;;  %v1324_v34 = vmul.f32 %v2631_v27, %v1267_v6 }
 0x202   : > { %v1291_v16 = vpack.c.bf16 %v1267_v6, %v1266_v17  ;;  %v1252_v21 = vadd.f32 %v2624_v22, %v1214_v15  ;;  %1345 = vadd.xlane.f32.xlu0 %v1321_v10  ;;  %v1323_v25 = vmul.f32 %v2631_v27, %v1266_v17 }
 0x203   : > { %v1269_v23 = vmax.f32 %v1253_v11, 0.0 }
 0x204   : > { %1303 = vst [vmem:[%s2636_s30 + $0x28] sm:$0xff] %v1291_v16  ;;  %v1268_v28 = vmax.f32 %v1252_v21, 0.0  ;;  %v2006_v24 = vpop.f32.mrb[14].mxu1 }
 0x205   : > { %v1255_v26 = vadd.f32 %v2006_v24, %v2624_v22  ;;  %v1224_v30 = vpop.f32.mrb[15].mxu1  ;;  %1347 = vadd.xlane.f32.xlu1 %v1322_v18  ;;  %v1326_v38 = vmul.f32 %v2631_v27, %v1269_v23 }
 0x206   : > { %v1292_v31 = vpack.c.bf16 %v1269_v23, %v1268_v28  ;;  %v1254_v32 = vadd.f32 %v2624_v22, %v1224_v30  ;;  %1349 = vadd.xlane.f32.xlu0 %v1323_v25  ;;  %v1325_v36 = vmul.f32 %v2631_v27, %v1268_v28 }
 0x207   : > { %v1271_v33 = vmax.f32 %v1255_v26, 0.0 }
 0x208   : > { %1304 = vst [vmem:[%s2636_s30 + $0x30] sm:$0xff] %v1292_v31  ;;  %v1270_v35 = vmax.f32 %v1254_v32, 0.0 }
 0x209   : > { %1351 = vadd.xlane.f32.xlu1 %v1324_v34  ;;  %v1328_v22 = vmul.f32 %v2631_v27, %v1271_v33 }
 0x20a   : > { %v1293_v37 = vpack.c.bf16 %v1271_v33, %v1270_v35  ;;  %1353 = vadd.xlane.f32.xlu0 %v1325_v36  ;;  %v1327_v39 = vmul.f32 %v2631_v27, %v1270_v35 }
 0x20c   : > { %1305 = vst [vmem:[%s2636_s30 + $0x38] sm:$0xff] %v1293_v37 }
 0x20d   : > { %1355 = vadd.xlane.f32.xlu1 %v1326_v38 }
 0x20e   : > { %1357 = vadd.xlane.f32.xlu0 %v1327_v39 }
 0x211   : > { %1359 = vadd.xlane.f32.xlu1 %v1328_v22 }
 0x27e   : > { %v1332_v29 = vpop.xlane.xlu0 %1331 }
 0x27f   : > { %v1369_v44 = vadd.f32 %v2673_v43, %v1332_v29 }
 0x281   : > { %v1762_v40 = vmul.f32 -1.442695, %v1369_v44 }
 0x282   : > { %v1336_v45 = vpop.xlane.xlu1 %1335  ;;  %v1330_v46 = vpop.xlane.xlu0 %1329 }
 0x283   : > { %2154 = vpow2.f32 %v1762_v40  ;;  %v1371_v41 = vadd.f32 %v2673_v43, %v1336_v45  ;;  %v1368_v47 = vadd.f32 %v2673_v43, %v1330_v46 }
 0x285   : > { %v1764_v48 = vmul.f32 -1.442695, %v1371_v41  ;;  %v1761_v53 = vmul.f32 -1.442695, %v1368_v47 }
 0x286   : > { %v1334_v27 = vpop.xlane.xlu1 %1333 }
 0x287   : > { %2156 = vpow2.f32 %v1764_v48  ;;  %v1370_v49 = vadd.f32 %v2673_v43, %v1334_v27  ;;  %v1338_v50 = vpop.xlane.xlu0 %1337 }
 0x288   : > { %2158 = vpow2.f32 %v1761_v53  ;;  %v1372_v54 = vadd.f32 %v2673_v43, %v1338_v50 }
 0x289   : > { %v1763_v51 = vmul.f32 -1.442695, %v1370_v49 }
 0x28a   : > { %v1765_v52 = vmul.f32 -1.442695, %v1372_v54  ;;  %v1340_v0 = vpop.xlane.xlu1 %1339 }
 0x28b   : > { %2160 = vpow2.f32 %v1763_v51  ;;  %v1373_v55 = vadd.f32 %v2673_v43, %v1340_v0  ;;  %v1342_v56 = vpop.xlane.xlu0 %1341 }
 0x28c   : > { %v1374_v3 = vadd.f32 %v2673_v43, %v1342_v56  ;;  %2162 = vpow2.f32 %v1765_v52 }
 0x28d   : > { %v2155_v57 = vpop.eup %2154  ;;  %v1766_v58 = vmul.f32 -1.442695, %v1373_v55 }
 0x28e   : > { %v1433_v59 = vadd.f32 1.0, %v2155_v57  ;;  %v1767_v60 = vmul.f32 -1.442695, %v1374_v3  ;;  %v1344_v12 = vpop.xlane.xlu1 %1343 }
 0x28f   : > { %2164 = vpow2.f32 %v1766_v58  ;;  %v1375_v19 = vadd.f32 %v2673_v43, %v1344_v12  ;;  %v1346_v61 = vpop.xlane.xlu0 %1345 }
 0x290   : > { %2166 = vrcp.f32 %v1433_v59  ;;  %v1376_v8 = vadd.f32 %v2673_v43, %v1346_v61 }
 0x291   : > { %v2157_v62 = vpop.eup %2156  ;;  %v1768_v13 = vmul.f32 -1.442695, %v1375_v19  ;;  %2168 = vpow2.f32 %v1767_v60 }
 0x292   : > { %v2159_v63 = vpop.eup %2158  ;;  %v1435_v1 = vadd.f32 1.0, %v2157_v62  ;;  %v1348_v20 = vpop.xlane.xlu1 %1347  ;;  %v1769_v17 = vmul.f32 -1.442695, %v1376_v8 }
 0x293   : > { %v1432_v2 = vadd.f32 1.0, %v2159_v63  ;;  %2170 = vpow2.f32 %v1768_v13  ;;  %v1377_v4 = vadd.f32 %v2673_v43, %v1348_v20  ;;  %v1350_v14 = vpop.xlane.xlu0 %1349 }
 0x294   : > { %2172 = vrcp.f32 %v1435_v1  ;;  %v1378_v9 = vadd.f32 %v2673_v43, %v1350_v14 }
 0x295   : > { %v2161_v5 = vpop.eup %2160  ;;  %2174 = vrcp.f32 %v1432_v2  ;;  %v1770_v6 = vmul.f32 -1.442695, %v1377_v4 }
 0x296   : > { %v1434_v7 = vadd.f32 1.0, %v2161_v5  ;;  %v1352_v10 = vpop.xlane.xlu1 %1351  ;;  %v2163_v16 = vpop.eup %2162  ;;  %v1771_v24 = vmul.f32 -1.442695, %v1378_v9 }
 0x297   : > { %2176 = vpow2.f32 %v1770_v6  ;;  %v1379_v11 = vadd.f32 %v2673_v43, %v1352_v10  ;;  %v1354_v15 = vpop.xlane.xlu0 %1353  ;;  %v1436_v32 = vadd.f32 1.0, %v2163_v16 }
 0x298   : > { %2178 = vrcp.f32 %v1434_v7  ;;  %v1380_v25 = vadd.f32 %v2673_v43, %v1354_v15 }
 0x299   : > { %v2165_v21 = vpop.eup %2164  ;;  %v1772_v23 = vmul.f32 -1.442695, %v1379_v11  ;;  %2180 = vpow2.f32 %v1769_v17 }
 0x29a   : > { %v2167_v18 = vpop.eup %2166  ;;  %v1437_v28 = vadd.f32 1.0, %v2165_v21  ;;  %v1356_v26 = vpop.xlane.xlu1 %1355  ;;  %v1773_v37 = vmul.f32 -1.442695, %v1380_v25 }
 0x29b   : > { %2182 = vpow2.f32 %v1772_v23  ;;  %v1381_v30 = vadd.f32 %v2673_v43, %v1356_v26  ;;  %1487 = vperm.xlu1 %2128, %v2167_v18   ;;  %v2169_v31 = vpop.eup %2168  ;;  %v1358_v33 = vpop.xlane.xlu0 %1357 }
 0x29c   : > { %2184 = vrcp.f32 %v1437_v28  ;;  %v1382_v42 = vadd.f32 %v2673_v43, %v1358_v33  ;;  %v1438_v46 = vadd.f32 1.0, %v2169_v31 }
 0x29d   : > { %v2171_v34 = vpop.eup %2170  ;;  %v1774_v35 = vmul.f32 -1.442695, %v1381_v30  ;;  %2186 = vpow2.f32 %v1771_v24 }
 0x29e   : > { %v2173_v36 = vpop.eup %2172  ;;  %v1360_v38 = vpop.xlane.xlu1 %1359  ;;  %v1439_v22 = vadd.f32 1.0, %v2171_v34  ;;  %v1775_v47 = vmul.f32 -1.442695, %v1382_v42 }
 0x29f   : > { %v2175_v39 = vpop.eup %2174  ;;  %2188 = vpow2.f32 %v1774_v35  ;;  %v1383_v29 = vadd.f32 %v2673_v43, %v1360_v38  ;;  %1497 = vperm.xlu1 %2128, %v2173_v36  }
 0x2a0   : > { %2190 = vrcp.f32 %v1436_v32  ;;  %1482 = vperm.xlu0 %2129, %v2175_v39  }
 0x2a1   : > { %v2177_v44 = vpop.eup %2176  ;;  %v1776_v40 = vmul.f32 -1.442695, %v1383_v29  ;;  %2192 = vpow2.f32 %v1773_v37 }
 0x2a2   : > { %v2179_v45 = vpop.eup %2178  ;;  %v1441_v41 = vadd.f32 1.0, %v2177_v44  ;;  %2194 = vrcp.f32 %v1439_v22 }
 0x2a3   : > { %1492 = vperm.xlu1 %2128, %v2179_v45   ;;  %v2181_v48 = vpop.eup %2180 }
 0x2a4   : > { %2196 = vrcp.f32 %v1441_v41  ;;  %v1440_v43 = vadd.f32 1.0, %v2181_v48 }
 0x2a5   : > { %v2183_v53 = vpop.eup %2182  ;;  %2198 = vpow2.f32 %v1776_v40 }
 0x2a6   : > { %v2185_v27 = vpop.eup %2184  ;;  %2200 = vrcp.f32 %v1438_v46  ;;  %v1443_v49 = vadd.f32 1.0, %v2183_v53 }
 0x2a7   : > { %2202 = vpow2.f32 %v1775_v47  ;;  %1507 = vperm.xlu1 %2128, %v2185_v27   ;;  %v2187_v50 = vpop.eup %2186 }
 0x2a8   : > { %2204 = vrcp.f32 %v1443_v49  ;;  %v1442_v55 = vadd.f32 1.0, %v2187_v50 }
 0x2a9   : > { %v2189_v54 = vpop.eup %2188  ;;  %2206 = vrcp.f32 %v1440_v43 }
 0x2aa   : > { %v2191_v51 = vpop.eup %2190  ;;  %v1445_v52 = vadd.f32 1.0, %v2189_v54 }
 0x2ab   : > { %1502 = vperm.xlu1 %2128, %v2191_v51   ;;  %v2193_v0 = vpop.eup %2192 }
 0x2ac   : > { %2208 = vrcp.f32 %v1445_v52  ;;  %v2195_v56 = vpop.eup %2194  ;;  %v1444_v59 = vadd.f32 1.0, %v2193_v0 }
 0x2ad   : > { %2210 = vrcp.f32 %v1442_v55 }
 0x2ae   : > { %v2197_v3 = vpop.eup %2196 }
 0x2af   : > { %v2199_v57 = vpop.eup %2198  ;;  %1527 = vperm.xlu0 %2129, %v2197_v3   ;;  %1517 = vperm.xlu1 %2128, %v2195_v56  }
 0x2b0   : > { %v2201_v58 = vpop.eup %2200  ;;  %v1447_v60 = vadd.f32 1.0, %v2199_v57 }
 0x2b1   : > { %v2203_v12 = vpop.eup %2202 }
 0x2b2   : > { %v2205_v19 = vpop.eup %2204  ;;  %2212 = vrcp.f32 %v1447_v60  ;;  %v1446_v61 = vadd.f32 1.0, %v2203_v12 }
 0x2b3   : > { %1537 = vperm.xlu0 %2129, %v2205_v19   ;;  %1512 = vperm.xlu1 %2128, %v2201_v58   ;;  %2214 = vrcp.f32 %v1444_v59  ;;  %v2207_v62 = vpop.eup %2206 }
 0x2b4   : > { %2216 = vrcp.f32 %v1446_v61 }
 0x2b6   : > { %v2209_v13 = vpop.eup %2208 }
 0x2b7   : > { %1547 = vperm.xlu0 %2129, %v2209_v13   ;;  %1522 = vperm.xlu1 %2128, %v2207_v62   ;;  %v2211_v63 = vpop.eup %2210 }
 0x2bb   : > { %1532 = vperm.xlu1 %2128, %v2211_v63  }
 0x2bc   : > { %v2213_v1 = vpop.eup %2212 }
 0x2bd   : > { %1557 = vperm.xlu0 %2129, %v2213_v1   ;;  %v2215_v8 = vpop.eup %2214 }
 0x2be   : > { %v2217_v20 = vpop.eup %2216 }
 0x2bf   : > { %1542 = vperm.xlu1 %2128, %v2215_v8  }
 0x2c3   : > { %1552 = vperm.xlu1 %2128, %v2217_v20  }
 0x31a   : > { %v1488_v2 = vpop.permute.xlu1 %1487 }
 0x31b   : > { %1561 = vst [vmem:[%s2755_s7 + $0x8] sm:$0xff] %v1488_v2 }
 0x31e   : > { %v1498_v4 = vpop.permute.xlu1 %1497 }
 0x31f   : > { %1563 = vst [vmem:[%s2755_s7 + $0x18] sm:$0xff] %v1498_v4  ;;  %v1483_v14 = vpop.permute.xlu0 %1482 }
 0x320   : > { %1560 = vst [vmem:[%s2755_s7] sm:$0xff] %v1483_v14 }
 0x322   : > { %v1493_v5 = vpop.permute.xlu1 %1492 }
 0x323   : > { %1562 = vst [vmem:[%s2755_s7 + $0x10] sm:$0xff] %v1493_v5 }
 0x326   : > { %v1508_v6 = vpop.permute.xlu1 %1507 }
 0x327   : > { %1565 = vst [vmem:[%s2755_s7 + $0x28] sm:$0xff] %v1508_v6 }
 0x32a   : > { %v1503_v7 = vpop.permute.xlu1 %1502 }
 0x32b   : > { %1564 = vst [vmem:[%s2755_s7 + $0x20] sm:$0xff] %v1503_v7 }
 0x32e   : > { %v1518_v17 = vpop.permute.xlu1 %1517  ;;  %v1528_v9 = vpop.permute.xlu0 %1527 }
 0x32f   : > { %1567 = vst [vmem:[%s2755_s7 + $0x38] sm:$0xff] %v1518_v17  ;;  %1569 = vst [vmem:[%s2755_s7 + $0x48] sm:$0xff] %v1528_v9 }
 0x332   : > { %v1513_v10 = vpop.permute.xlu1 %1512  ;;  %v1538_v11 = vpop.permute.xlu0 %1537 }
 0x333   : > { %1566 = vst [vmem:[%s2755_s7 + $0x30] sm:$0xff] %v1513_v10  ;;  %1571 = vst [vmem:[%s2755_s7 + $0x58] sm:$0xff] %v1538_v11 }
 0x336   : > { %v1523_v15 = vpop.permute.xlu1 %1522  ;;  %v1548_v16 = vpop.permute.xlu0 %1547 }
 0x337   : > { %1568 = vst [vmem:[%s2755_s7 + $0x40] sm:$0xff] %v1523_v15  ;;  %1573 = vst [vmem:[%s2755_s7 + $0x68] sm:$0xff] %v1548_v16 }
 0x33a   : > { %v1533_v21 = vpop.permute.xlu1 %1532 }
 0x33b   : > { %1570 = vst [vmem:[%s2755_s7 + $0x50] sm:$0xff] %v1533_v21 }
 0x33c   : > { %v1558_v23 = vpop.permute.xlu0 %1557 }
 0x33d   : > { %1575 = vst [vmem:[%s2755_s7 + $0x78] sm:$0xff] %v1558_v23 }
 0x33e   : > { %v1543_v18 = vpop.permute.xlu1 %1542 }
 0x33f   : > { %1572 = vst [vmem:[%s2755_s7 + $0x60] sm:$0xff] %v1543_v18 }
 0x342   : > { %v1553_v28 = vpop.permute.xlu1 %1552 }
 0x343   : > { %1574 = vst [vmem:[%s2755_s7 + $0x70] sm:$0xff] %v1553_v28 }
 0x344 PF: > { %s19_s28 = sadd.s32 1, %s2240_s28   ;;  %s2758_s26 = smov %s2236_s27 }
 0x345   : > { %p16_p10 = scmp.ge.s32.totalorder %s19_s28, 4   ;;  %s2759_s27 = smov %s2761_s6 }
 0x347   :  { %18 = sbr.rel (!%p16_p10) target bundleno = 3 (0x3), region = 100 }

</bundles_post_ra>
